<compile_context>
chip_gen: v7x
topology: tpu7x:2x2x1
jax: 0.10.0
libtpu: 0.0.40
codegen_flags: <defaults>
</compile_context>

<pallas_src>
import jax
import jax.numpy as jnp
from jax.experimental import pallas as pl
from jax.experimental.pallas import tpu as pltpu

NEG_SLOPE = 0.03
EPS = 1e-5
KSIZE = 31
PAD = 15
GROUP_K = 256                       # target MXU contraction width (use 128 on v5e)
PRE_E, POST_E = (PAD + 1) // 2, PAD // 2   # even-tap phase zero pads (8, 7)
PRE_O, POST_O = PAD // 2, (PAD + 1) // 2   # odd-tap  phase zero pads (7, 8)


# -----------------------------------------------------------------------------
# Fused layer kernel:  [VBN + LeakyReLU] -> Conv1d(k=31, s=2, p=15) -> stats
# -----------------------------------------------------------------------------
def _make_conv_vbn_kernel(N, C_pad, C_out, Lh, e_taps, o_taps, n_we, n_wo,
                          apply_norm):
    L_out = Lh
    Lp = Lh + PAD                    # padded phase length

    def kernel(*refs):
        idx = 0
        p1_ref = refs[idx]; idx += 1           # even-tap phase (zero padded)
        p0_ref = refs[idx]; idx += 1           # odd-tap  phase (zero padded)
        if apply_norm:
            scale_ref = refs[idx]; idx += 1    # (C_pad, 1) fp32
            shift_ref = refs[idx]; idx += 1
        we_refs = refs[idx:idx + n_we]; idx += n_we
        wo_refs = refs[idx:idx + n_wo]; idx += n_wo
        b_ref = refs[idx]; idx += 1
        y_ref, sum_ref, sq_ref = refs[idx], refs[idx + 1], refs[idx + 2]

        if apply_norm:
            sc = scale_ref[...]
            sh = shift_ref[...]
            lane = jax.lax.broadcasted_iota(jnp.int32, (C_pad, Lp), 1)
            # keep the conv's zero padding exact after the affine pre-norm
            mask_e = jnp.logical_and(lane >= PRE_E, lane < PRE_E + Lh)
            mask_o = jnp.logical_and(lane >= PRE_O, lane < PRE_O + Lh)

        def stack(xp, lo, hi):
            # im2col for one tap group: ((hi-lo)*C_pad, L_out), tap-major rows
            if hi - lo == 1:
                s = xp[:, lo:lo + L_out]
            else:
                s = jnp.concatenate(
                    [xp[:, m:m + L_out] for m in range(lo, hi)], axis=0)
            return s.astype(jnp.bfloat16)       # bf16 operand, fp32 accumulate

        tot = jnp.zeros((C_out, 1), jnp.float32)
        tot_sq = jnp.zeros((C_out, 1), jnp.float32)
        for n in range(N):
            xe = p1_ref[n].astype(jnp.float32)   # (C_pad, Lp)
            xo = p0_ref[n].astype(jnp.float32)
            if apply_norm:                       # previous layer's VBN + lrelu
                xe = xe * sc + sh
                xo = xo * sc + sh
                xe = jnp.where(xe >= 0, xe, NEG_SLOPE * xe)
                xo = jnp.where(xo >= 0, xo, NEG_SLOPE * xo)
                xe = jnp.where(mask_e, xe, 0.0)
                xo = jnp.where(mask_o, xo, 0.0)

            acc = jnp.zeros((C_out, L_out), jnp.float32)
            for g, (lo, hi) in enumerate(e_taps):     # grouped even taps
                acc = acc + jnp.dot(we_refs[g][...], stack(xe, lo, hi),
                                    preferred_element_type=jnp.float32)
            for g, (lo, hi) in enumerate(o_taps):     # grouped odd taps
                acc = acc + jnp.dot(wo_refs[g][...], stack(xo, lo, hi),
                                    preferred_element_type=jnp.float32)
            acc = acc + b_ref[...]                    # (C_out, 1) broadcast

            y_ref[n] = acc.astype(y_ref.dtype)
            # VirtualBatchNorm statistics of the raw conv output, in fp32
            tot = tot + jnp.sum(acc, axis=-1, keepdims=True)
            tot_sq = tot_sq + jnp.sum(acc * acc, axis=-1, keepdims=True)

        sum_ref[...] = tot
        sq_ref[...] = tot_sq

    return kernel


def conv_vbn_layer(h, scale, shift, conv_p, *, apply_norm):
    """One fused pallas_call: pre-norm+lrelu, stride-2 k=31 conv, VBN stats."""
    N, C_in, L = h.shape
    assert L % 2 == 0
    Lh = L // 2
    C_pad = conv_p['c_in_pad']
    C_out = conv_p['c_out']
    Lp = Lh + PAD

    # Cheap XLA glue: stride-2 phase split + zero pad (channels up to a
    # multiple of 8, length by the symmetric conv padding's even/odd phases).
    p1 = jnp.pad(h[:, :, 1::2], ((0, 0), (0, C_pad - C_in), (PRE_E, POST_E)))
    p0 = jnp.pad(h[:, :, 0::2], ((0, 0), (0, C_pad - C_in), (PRE_O, POST_O)))

    inputs = [p1, p0]
    in_specs = [pl.BlockSpec((N, C_pad, Lp), lambda i: (0, 0, 0)),
                pl.BlockSpec((N, C_pad, Lp), lambda i: (0, 0, 0))]
    if apply_norm:
        if C_pad != C_in:
            scale = jnp.pad(scale, ((0, C_pad - C_in), (0, 0)))
            shift = jnp.pad(shift, ((0, C_pad - C_in), (0, 0)))
        inputs += [scale, shift]
        in_specs += [pl.BlockSpec((C_pad, 1), lambda i: (0, 0)),
                     pl.BlockSpec((C_pad, 1), lambda i: (0, 0))]
    for wg in conv_p['we'] + conv_p['wo']:
        inputs.append(wg)
        in_specs.append(pl.BlockSpec(wg.shape, lambda i: (0, 0)))
    inputs.append(conv_p['b'])
    in_specs.append(pl.BlockSpec((C_out, 1), lambda i: (0, 0)))

    kernel = _make_conv_vbn_kernel(N, C_pad, C_out, Lh,
                                   conv_p['e_taps'], conv_p['o_taps'],
                                   len(conv_p['we']), len(conv_p['wo']),
                                   apply_norm)

    y, ssum, ssq = pl.pallas_call(
        kernel,
        out_shape=(jax.ShapeDtypeStruct((N, C_out, Lh), jnp.bfloat16),
                   jax.ShapeDtypeStruct((C_out, 1), jnp.float32),
                   jax.ShapeDtypeStruct((C_out, 1), jnp.float32)),
        grid=(1,),
        in_specs=in_specs,
        out_specs=(pl.BlockSpec((N, C_out, Lh), lambda i: (0, 0, 0)),
                   pl.BlockSpec((C_out, 1), lambda i: (0, 0)),
                   pl.BlockSpec((C_out, 1), lambda i: (0, 0))),
        compiler_params=pltpu.CompilerParams(
            dimension_semantics=("arbitrary",)),
    )(*inputs)
    return y, ssum, ssq


# -----------------------------------------------------------------------------
# Fused tail: last VBN + LeakyReLU -> Conv1d(C->1, k=1) -> LeakyReLU -> Linear
# -----------------------------------------------------------------------------
def tail_pallas(y, scale, shift, w1, b1, fw, fb):
    N, C, Lf = y.shape

    def kernel(y_ref, sc_ref, sh_ref, w1_ref, b1_ref, fw_ref, fb_ref,
               out_ref, feat_ref):
        sc = sc_ref[...]
        sh = sh_ref[...]
        w1v = w1_ref[...]
        fwv = fw_ref[...]
        for n in range(N):
            h = y_ref[n].astype(jnp.float32) * sc + sh            # (C, Lf)
            h = jnp.where(h >= 0, h, NEG_SLOPE * h)
            f = jnp.dot(w1v, h, preferred_element_type=jnp.float32) + b1_ref[...]
            f = jnp.where(f >= 0, f, NEG_SLOPE * f)               # (1, Lf)
            feat_ref[n] = f.astype(feat_ref.dtype)
            o = jnp.sum(f * fwv, axis=-1, keepdims=True) + fb_ref[...]  # (1, 1)
            out_ref[n] = o.astype(out_ref.dtype)

    out3, feat = pl.pallas_call(
        kernel,
        out_shape=(jax.ShapeDtypeStruct((N, 1, 1), jnp.float32),
                   jax.ShapeDtypeStruct((N, 1, Lf), jnp.float32)),
        grid=(1,),
        in_specs=[
            pl.BlockSpec((N, C, Lf), lambda i: (0, 0, 0)),
            pl.BlockSpec((C, 1), lambda i: (0, 0)),
            pl.BlockSpec((C, 1), lambda i: (0, 0)),
            pl.BlockSpec((1, C), lambda i: (0, 0)),
            pl.BlockSpec((1, 1), lambda i: (0, 0)),
            pl.BlockSpec((1, Lf), lambda i: (0, 0)),
            pl.BlockSpec((1, 1), lambda i: (0, 0)),
        ],
        out_specs=(pl.BlockSpec((N, 1, 1), lambda i: (0, 0, 0)),
                   pl.BlockSpec((N, 1, Lf), lambda i: (0, 0, 0))),
    )(y, scale, shift, w1, b1, fw, fb)
    return out3.reshape(N, 1), feat


# -----------------------------------------------------------------------------
# Parameter construction & one-time weight regrouping (hoisted out of forward)
# -----------------------------------------------------------------------------
def _xavier_normal(key, shape_conv):
    c_out, c_in, k = shape_conv
    std = (2.0 / ((c_in + c_out) * k)) ** 0.5
    return std * jax.random.normal(key, shape_conv, jnp.float32)


def _prep_conv(w, b, group_k=GROUP_K):
    """Slice per-tap weights and regroup into wide bf16 matmul operands
    (tap-major / channel-minor columns match the in-kernel im2col stacking)."""
    C_out, C_in, K = w.shape
    C_pad = -(-C_in // 8) * 8
    if C_pad != C_in:
        w = jnp.pad(w, ((0, 0), (0, C_pad - C_in), (0, 0)))
    taps_e = [w[:, :, 2 * m] for m in range((K + 1) // 2)]   # even taps
    taps_o = [w[:, :, 2 * m + 1] for m in range(K // 2)]     # odd taps
    G = max(1, group_k // C_pad)

    def group(taps):
        mats, ranges = [], []
        for lo in range(0, len(taps), G):
            hi = min(lo + G, len(taps))
            if hi - lo == 1:
                mats.append(taps[lo].astype(jnp.bfloat16))
            else:
                mats.append(jnp.concatenate(taps[lo:hi], axis=1)
                            .astype(jnp.bfloat16))
            ranges.append((lo, hi))
        return mats, ranges

    we, e_taps = group(taps_e)
    wo, o_taps = group(taps_o)
    return {'we': we, 'wo': wo, 'e_taps': e_taps, 'o_taps': o_taps,
            'b': b.reshape(C_out, 1).astype(jnp.float32),
            'c_in': C_in, 'c_in_pad': C_pad, 'c_out': C_out}


def init_params(key, dis_n_layers):
    keys = iter(jax.random.split(key, 64))
    in_c, out_c = 2, 32
    w = _xavier_normal(next(keys), (out_c, in_c, KSIZE))
    b = 0.01 * jax.random.normal(next(keys), (out_c,), jnp.float32)
    params = {
        'conv_first': _prep_conv(w, b),
        'vbn_first': {
            'gamma': 1.0 + 0.02 * jax.random.normal(next(keys), (out_c, 1), jnp.float32),
            'beta': jnp.zeros((out_c, 1), jnp.float32)},
    }
    convs, vbns = [], []
    c = out_c
    for i in range(1, dis_n_layers - 1):
        c_out_i = c if (i % 2 == 0) else c * 2
        w = _xavier_normal(next(keys), (c_out_i, c, KSIZE))
        b = 0.01 * jax.random.normal(next(keys), (c_out_i,), jnp.float32)
        convs.append(_prep_conv(w, b))
        vbns.append({
            'gamma': 1.0 + 0.02 * jax.random.normal(next(keys), (c_out_i, 1), jnp.float32),
            'beta': jnp.zeros((c_out_i, 1), jnp.float32)})
        c = c_out_i
    params['convs'] = convs
    params['vbns'] = vbns
    wf = _xavier_normal(next(keys), (1, c, 1))
    params['conv_final'] = {
        'w': wf.reshape(1, c),
        'b': (0.01 * jax.random.normal(next(keys), (1,), jnp.float32)).reshape(1, 1)}
    params['fc'] = {
        'w': (1.0 / 8 ** 0.5) * jax.random.normal(next(keys), (1, 8), jnp.float32),
        'b': jnp.zeros((1, 1), jnp.float32)}
    return params


# -----------------------------------------------------------------------------
# Discriminator forward: (x, ref_x) -> (logits, feat)
# -----------------------------------------------------------------------------
def _vbn_scale_shift(mean, meansq, gamma, beta):
    """Tiny per-channel VBN math (O(C) scalars) kept in plain JAX."""
    std = jnp.sqrt(EPS + meansq - mean * mean)
    scale = gamma / std
    shift = beta - mean * scale
    return scale, shift


def discriminator_forward(params, x, ref_x):
    N = x.shape[0]
    new_c = 1.0 / (N + 1.0)          # VirtualBatchNorm reference-combine coeffs
    old_c = 1.0 - new_c

    conv_ps = [params['conv_first']] + params['convs']
    vbn_ps = [params['vbn_first']] + params['vbns']

    # reference pass: collect per-layer raw VBN statistics
    ref_stats = []
    h, scale, shift = ref_x, None, None
    for li, (cp, vp) in enumerate(zip(conv_ps, vbn_ps)):
        h, ssum, ssq = conv_vbn_layer(h, scale, shift, cp, apply_norm=(li > 0))
        cnt = float(h.shape[0] * h.shape[2])
        m, ms = ssum / cnt, ssq / cnt
        ref_stats.append((m, ms))
        scale, shift = _vbn_scale_shift(m, ms, vp['gamma'], vp['beta'])

    # main pass, normalizing with (batch, reference)-combined statistics
    # TODO(synk): the PyTorch reference indexes `means[0, 0]` for vbn_first, which
    # is not runnable (tuple index into a Python list; channel mismatch) — as in
    # the previous version we use vbn_first's own reference stats (mean1/meansq1).
    h, scale, shift = x, None, None
    for li, (cp, vp) in enumerate(zip(conv_ps, vbn_ps)):
        h, ssum, ssq = conv_vbn_layer(h, scale, shift, cp, apply_norm=(li > 0))
        cnt = float(h.shape[0] * h.shape[2])
        m = new_c * (ssum / cnt) + old_c * ref_stats[li][0]
        ms = new_c * (ssq / cnt) + old_c * ref_stats[li][1]
        scale, shift = _vbn_scale_shift(m, ms, vp['gamma'], vp['beta'])

    # fused tail: last VBN + LeakyReLU + 1x1 conv + LeakyReLU + Linear(8 -> 1)
    out, feat = tail_pallas(h, scale, shift,
                            params['conv_final']['w'], params['conv_final']['b'],
                            params['fc']['w'], params['fc']['b'])
    return out, feat


if __name__ == "__main__":
    dis_n_layers = 4        # conv_first + 2 mid conv layers -> 3 stride-2 convs
    N, L = 2, 64            # 64 / 2^3 = 8 matches Linear(in_features=8)

    key = jax.random.PRNGKey(0)
    kp, kx, kr = jax.random.split(key, 3)
    params = init_params(kp, dis_n_layers)

    x = jax.random.normal(kx, (N, 2, L), jnp.float32)
    ref_x = jax.random.normal(kr, (N, 2, L), jnp.float32)

    out, feat = discriminator_forward(params, x, ref_x)
    out = jax.block_until_ready(out)
    feat = jax.block_until_ready(feat)

    assert out.shape == (N, 1), out.shape
    assert feat.shape == (N, 1, 8), feat.shape
    assert bool(jnp.all(jnp.isfinite(out))) and bool(jnp.all(jnp.isfinite(feat)))
    print("KERNEL_OK")
</pallas_src>

<mosaic_0001>
module attributes {stable_mosaic.version = 11 : i64} {
  func.func @kernel(%arg0: i32, %arg1: memref<2x8x47xf32, #tpu.memory_space<vmem>>, %arg2: memref<2x8x47xf32, #tpu.memory_space<vmem>>, %arg3: memref<32x128xbf16, #tpu.memory_space<vmem>>, %arg4: memref<32x120xbf16, #tpu.memory_space<vmem>>, %arg5: memref<32x1xf32, #tpu.memory_space<vmem>>, %arg6: memref<2x32x32xbf16, #tpu.memory_space<vmem>>, %arg7: memref<32x1xf32, #tpu.memory_space<vmem>>, %arg8: memref<32x1xf32, #tpu.memory_space<vmem>>) attributes {dimension_semantics = [#tpu.dimension_semantics<arbitrary>], iteration_bounds = array<i64: 1>, scalar_prefetch = 0 : i64, scratch_operands = 0 : i64, tpu.core_type = #tpu.core_type<tc>, window_params = [{pipeline_mode = #tpu.pipeline_mode<synchronous>, transform_indices = @transform_0, window_bounds = array<i64: 2, 8, 47>}, {pipeline_mode = #tpu.pipeline_mode<synchronous>, transform_indices = @transform_1, window_bounds = array<i64: 2, 8, 47>}, {pipeline_mode = #tpu.pipeline_mode<synchronous>, transform_indices = @transform_2, window_bounds = array<i64: 32, 128>}, {pipeline_mode = #tpu.pipeline_mode<synchronous>, transform_indices = @transform_3, window_bounds = array<i64: 32, 120>}, {pipeline_mode = #tpu.pipeline_mode<synchronous>, transform_indices = @transform_4, window_bounds = array<i64: 32, 1>}, {pipeline_mode = #tpu.pipeline_mode<synchronous>, transform_indices = @transform_5, window_bounds = array<i64: 2, 32, 32>}, {pipeline_mode = #tpu.pipeline_mode<synchronous>, transform_indices = @transform_6, window_bounds = array<i64: 32, 1>}, {pipeline_mode = #tpu.pipeline_mode<synchronous>, transform_indices = @transform_7, window_bounds = array<i64: 32, 1>}]} {
    %cst = arith.constant 0.000000e+00 : f32
    %0 = vector.broadcast %cst : f32 to vector<32x1xf32>
    %cst_0 = arith.constant 0.000000e+00 : f32
    %1 = vector.broadcast %cst_0 : f32 to vector<32x1xf32>
    %c0 = arith.constant 0 : index
    %c0_1 = arith.constant 0 : index
    %c0_2 = arith.constant 0 : index
    %2 = vector.load %arg1[%c0, %c0_1, %c0_2] : memref<2x8x47xf32, #tpu.memory_space<vmem>>, vector<1x8x47xf32>
    %3 = vector.shape_cast %2 : vector<1x8x47xf32> to vector<8x47xf32>
    %c0_3 = arith.constant 0 : index
    %c0_4 = arith.constant 0 : index
    %c0_5 = arith.constant 0 : index
    %4 = vector.load %arg2[%c0_3, %c0_4, %c0_5] : memref<2x8x47xf32, #tpu.memory_space<vmem>>, vector<1x8x47xf32>
    %5 = vector.shape_cast %4 : vector<1x8x47xf32> to vector<8x47xf32>
    %cst_6 = arith.constant 0.000000e+00 : f32
    %6 = vector.broadcast %cst_6 : f32 to vector<32x32xf32>
    %c0_7 = arith.constant 0 : index
    %c0_8 = arith.constant 0 : index
    %7 = vector.load %arg3[%c0_7, %c0_8] : memref<32x128xbf16, #tpu.memory_space<vmem>>, vector<32x128xbf16>
    %8 = vector.extract_strided_slice %3 {offsets = [0, 0], sizes = [8, 32], strides = [1, 1]} : vector<8x47xf32> to vector<8x32xf32>
    %9 = vector.extract_strided_slice %3 {offsets = [0, 1], sizes = [8, 32], strides = [1, 1]} : vector<8x47xf32> to vector<8x32xf32>
    %10 = vector.extract_strided_slice %3 {offsets = [0, 2], sizes = [8, 32], strides = [1, 1]} : vector<8x47xf32> to vector<8x32xf32>
    %11 = vector.extract_strided_slice %3 {offsets = [0, 3], sizes = [8, 32], strides = [1, 1]} : vector<8x47xf32> to vector<8x32xf32>
    %12 = vector.extract_strided_slice %3 {offsets = [0, 4], sizes = [8, 32], strides = [1, 1]} : vector<8x47xf32> to vector<8x32xf32>
    %13 = vector.extract_strided_slice %3 {offsets = [0, 5], sizes = [8, 32], strides = [1, 1]} : vector<8x47xf32> to vector<8x32xf32>
    %14 = vector.extract_strided_slice %3 {offsets = [0, 6], sizes = [8, 32], strides = [1, 1]} : vector<8x47xf32> to vector<8x32xf32>
    %15 = vector.extract_strided_slice %3 {offsets = [0, 7], sizes = [8, 32], strides = [1, 1]} : vector<8x47xf32> to vector<8x32xf32>
    %16 = vector.extract_strided_slice %3 {offsets = [0, 8], sizes = [8, 32], strides = [1, 1]} : vector<8x47xf32> to vector<8x32xf32>
    %17 = vector.extract_strided_slice %3 {offsets = [0, 9], sizes = [8, 32], strides = [1, 1]} : vector<8x47xf32> to vector<8x32xf32>
    %18 = vector.extract_strided_slice %3 {offsets = [0, 10], sizes = [8, 32], strides = [1, 1]} : vector<8x47xf32> to vector<8x32xf32>
    %19 = vector.extract_strided_slice %3 {offsets = [0, 11], sizes = [8, 32], strides = [1, 1]} : vector<8x47xf32> to vector<8x32xf32>
    %20 = vector.extract_strided_slice %3 {offsets = [0, 12], sizes = [8, 32], strides = [1, 1]} : vector<8x47xf32> to vector<8x32xf32>
    %21 = vector.extract_strided_slice %3 {offsets = [0, 13], sizes = [8, 32], strides = [1, 1]} : vector<8x47xf32> to vector<8x32xf32>
    %22 = vector.extract_strided_slice %3 {offsets = [0, 14], sizes = [8, 32], strides = [1, 1]} : vector<8x47xf32> to vector<8x32xf32>
    %23 = vector.extract_strided_slice %3 {offsets = [0, 15], sizes = [8, 32], strides = [1, 1]} : vector<8x47xf32> to vector<8x32xf32>
    %24 = tpu.concatenate %8, %9, %10, %11, %12, %13, %14, %15, %16, %17, %18, %19, %20, %21, %22, %23 in 0 : vector<8x32xf32>, vector<8x32xf32>, vector<8x32xf32>, vector<8x32xf32>, vector<8x32xf32>, vector<8x32xf32>, vector<8x32xf32>, vector<8x32xf32>, vector<8x32xf32>, vector<8x32xf32>, vector<8x32xf32>, vector<8x32xf32>, vector<8x32xf32>, vector<8x32xf32>, vector<8x32xf32>, vector<8x32xf32> -> vector<128x32xf32>
    %25 = arith.truncf %24 : vector<128x32xf32> to vector<128x32xbf16>
    %cst_9 = arith.constant dense<0.000000e+00> : vector<32x32xf32>
    %26 = tpu.matmul %7, %25, %cst_9 {dimension_numbers = #tpu.dot_dimension_numbers<[1], [0], [0], [1], [0, 0, 1, 1], [], []>} : vector<32x128xbf16>, vector<128x32xbf16>, vector<32x32xf32> -> vector<32x32xf32>
    %27 = arith.addf %6, %26 : vector<32x32xf32>
    %c0_10 = arith.constant 0 : index
    %c0_11 = arith.constant 0 : index
    %28 = vector.load %arg4[%c0_10, %c0_11] : memref<32x120xbf16, #tpu.memory_space<vmem>>, vector<32x120xbf16>
    %29 = vector.extract_strided_slice %5 {offsets = [0, 0], sizes = [8, 32], strides = [1, 1]} : vector<8x47xf32> to vector<8x32xf32>
    %30 = vector.extract_strided_slice %5 {offsets = [0, 1], sizes = [8, 32], strides = [1, 1]} : vector<8x47xf32> to vector<8x32xf32>
    %31 = vector.extract_strided_slice %5 {offsets = [0, 2], sizes = [8, 32], strides = [1, 1]} : vector<8x47xf32> to vector<8x32xf32>
    %32 = vector.extract_strided_slice %5 {offsets = [0, 3], sizes = [8, 32], strides = [1, 1]} : vector<8x47xf32> to vector<8x32xf32>
    %33 = vector.extract_strided_slice %5 {offsets = [0, 4], sizes = [8, 32], strides = [1, 1]} : vector<8x47xf32> to vector<8x32xf32>
    %34 = vector.extract_strided_slice %5 {offsets = [0, 5], sizes = [8, 32], strides = [1, 1]} : vector<8x47xf32> to vector<8x32xf32>
    %35 = vector.extract_strided_slice %5 {offsets = [0, 6], sizes = [8, 32], strides = [1, 1]} : vector<8x47xf32> to vector<8x32xf32>
    %36 = vector.extract_strided_slice %5 {offsets = [0, 7], sizes = [8, 32], strides = [1, 1]} : vector<8x47xf32> to vector<8x32xf32>
    %37 = vector.extract_strided_slice %5 {offsets = [0, 8], sizes = [8, 32], strides = [1, 1]} : vector<8x47xf32> to vector<8x32xf32>
    %38 = vector.extract_strided_slice %5 {offsets = [0, 9], sizes = [8, 32], strides = [1, 1]} : vector<8x47xf32> to vector<8x32xf32>
    %39 = vector.extract_strided_slice %5 {offsets = [0, 10], sizes = [8, 32], strides = [1, 1]} : vector<8x47xf32> to vector<8x32xf32>
    %40 = vector.extract_strided_slice %5 {offsets = [0, 11], sizes = [8, 32], strides = [1, 1]} : vector<8x47xf32> to vector<8x32xf32>
    %41 = vector.extract_strided_slice %5 {offsets = [0, 12], sizes = [8, 32], strides = [1, 1]} : vector<8x47xf32> to vector<8x32xf32>
    %42 = vector.extract_strided_slice %5 {offsets = [0, 13], sizes = [8, 32], strides = [1, 1]} : vector<8x47xf32> to vector<8x32xf32>
    %43 = vector.extract_strided_slice %5 {offsets = [0, 14], sizes = [8, 32], strides = [1, 1]} : vector<8x47xf32> to vector<8x32xf32>
    %44 = tpu.concatenate %29, %30, %31, %32, %33, %34, %35, %36, %37, %38, %39, %40, %41, %42, %43 in 0 : vector<8x32xf32>, vector<8x32xf32>, vector<8x32xf32>, vector<8x32xf32>, vector<8x32xf32>, vector<8x32xf32>, vector<8x32xf32>, vector<8x32xf32>, vector<8x32xf32>, vector<8x32xf32>, vector<8x32xf32>, vector<8x32xf32>, vector<8x32xf32>, vector<8x32xf32>, vector<8x32xf32> -> vector<120x32xf32>
    %45 = arith.truncf %44 : vector<120x32xf32> to vector<120x32xbf16>
    %cst_12 = arith.constant dense<0.000000e+00> : vector<32x32xf32>
    %46 = tpu.matmul %28, %45, %cst_12 {dimension_numbers = #tpu.dot_dimension_numbers<[1], [0], [0], [1], [0, 0, 1, 1], [], []>} : vector<32x120xbf16>, vector<120x32xbf16>, vector<32x32xf32> -> vector<32x32xf32>
    %47 = arith.addf %27, %46 : vector<32x32xf32>
    %c0_13 = arith.constant 0 : index
    %c0_14 = arith.constant 0 : index
    %48 = vector.load %arg5[%c0_13, %c0_14] : memref<32x1xf32, #tpu.memory_space<vmem>>, vector<32x1xf32>
    %49 = vector.broadcast %48 : vector<32x1xf32> to vector<32x32xf32>
    %50 = arith.addf %47, %49 : vector<32x32xf32>
    %51 = arith.truncf %50 : vector<32x32xf32> to vector<32x32xbf16>
    %c0_15 = arith.constant 0 : index
    %c0_16 = arith.constant 0 : index
    %c0_17 = arith.constant 0 : index
    %52 = vector.load %arg6[%c0_15, %c0_16, %c0_17] : memref<2x32x32xbf16, #tpu.memory_space<vmem>>, vector<1x32x32xbf16>
    %53 = vector.shape_cast %52 : vector<1x32x32xbf16> to vector<32x32xbf16>
    %54 = vector.shape_cast %51 : vector<32x32xbf16> to vector<1x32x32xbf16>
    tpu.vector_store %arg6[%c0_15, %c0_16, %c0_17], %54 {strides = array<i32>} : memref<2x32x32xbf16, #tpu.memory_space<vmem>>, vector<1x32x32xbf16>,
    %cst_18 = arith.constant dense<0.000000e+00> : vector<32xf32>
    %55 = vector.multi_reduction <add>, %50, %cst_18 [1] : vector<32x32xf32> to vector<32xf32>
    %56 = vector.shape_cast %55 : vector<32xf32> to vector<32x1xf32>
    %57 = arith.addf %0, %56 : vector<32x1xf32>
    %58 = arith.mulf %50, %50 : vector<32x32xf32>
    %cst_19 = arith.constant dense<0.000000e+00> : vector<32xf32>
    %59 = vector.multi_reduction <add>, %58, %cst_19 [1] : vector<32x32xf32> to vector<32xf32>
    %60 = vector.shape_cast %59 : vector<32xf32> to vector<32x1xf32>
    %61 = arith.addf %1, %60 : vector<32x1xf32>
    %c1 = arith.constant 1 : index
    %c0_20 = arith.constant 0 : index
    %c0_21 = arith.constant 0 : index
    %62 = vector.load %arg1[%c1, %c0_20, %c0_21] : memref<2x8x47xf32, #tpu.memory_space<vmem>>, vector<1x8x47xf32>
    %63 = vector.shape_cast %62 : vector<1x8x47xf32> to vector<8x47xf32>
    %c1_22 = arith.constant 1 : index
    %c0_23 = arith.constant 0 : index
    %c0_24 = arith.constant 0 : index
    %64 = vector.load %arg2[%c1_22, %c0_23, %c0_24] : memref<2x8x47xf32, #tpu.memory_space<vmem>>, vector<1x8x47xf32>
    %65 = vector.shape_cast %64 : vector<1x8x47xf32> to vector<8x47xf32>
    %cst_25 = arith.constant 0.000000e+00 : f32
    %66 = vector.broadcast %cst_25 : f32 to vector<32x32xf32>
    %c0_26 = arith.constant 0 : index
    %c0_27 = arith.constant 0 : index
    %67 = vector.load %arg3[%c0_26, %c0_27] : memref<32x128xbf16, #tpu.memory_space<vmem>>, vector<32x128xbf16>
    %68 = vector.extract_strided_slice %63 {offsets = [0, 0], sizes = [8, 32], strides = [1, 1]} : vector<8x47xf32> to vector<8x32xf32>
    %69 = vector.extract_strided_slice %63 {offsets = [0, 1], sizes = [8, 32], strides = [1, 1]} : vector<8x47xf32> to vector<8x32xf32>
    %70 = vector.extract_strided_slice %63 {offsets = [0, 2], sizes = [8, 32], strides = [1, 1]} : vector<8x47xf32> to vector<8x32xf32>
    %71 = vector.extract_strided_slice %63 {offsets = [0, 3], sizes = [8, 32], strides = [1, 1]} : vector<8x47xf32> to vector<8x32xf32>
    %72 = vector.extract_strided_slice %63 {offsets = [0, 4], sizes = [8, 32], strides = [1, 1]} : vector<8x47xf32> to vector<8x32xf32>
    %73 = vector.extract_strided_slice %63 {offsets = [0, 5], sizes = [8, 32], strides = [1, 1]} : vector<8x47xf32> to vector<8x32xf32>
    %74 = vector.extract_strided_slice %63 {offsets = [0, 6], sizes = [8, 32], strides = [1, 1]} : vector<8x47xf32> to vector<8x32xf32>
    %75 = vector.extract_strided_slice %63 {offsets = [0, 7], sizes = [8, 32], strides = [1, 1]} : vector<8x47xf32> to vector<8x32xf32>
    %76 = vector.extract_strided_slice %63 {offsets = [0, 8], sizes = [8, 32], strides = [1, 1]} : vector<8x47xf32> to vector<8x32xf32>
    %77 = vector.extract_strided_slice %63 {offsets = [0, 9], sizes = [8, 32], strides = [1, 1]} : vector<8x47xf32> to vector<8x32xf32>
    %78 = vector.extract_strided_slice %63 {offsets = [0, 10], sizes = [8, 32], strides = [1, 1]} : vector<8x47xf32> to vector<8x32xf32>
    %79 = vector.extract_strided_slice %63 {offsets = [0, 11], sizes = [8, 32], strides = [1, 1]} : vector<8x47xf32> to vector<8x32xf32>
    %80 = vector.extract_strided_slice %63 {offsets = [0, 12], sizes = [8, 32], strides = [1, 1]} : vector<8x47xf32> to vector<8x32xf32>
    %81 = vector.extract_strided_slice %63 {offsets = [0, 13], sizes = [8, 32], strides = [1, 1]} : vector<8x47xf32> to vector<8x32xf32>
    %82 = vector.extract_strided_slice %63 {offsets = [0, 14], sizes = [8, 32], strides = [1, 1]} : vector<8x47xf32> to vector<8x32xf32>
    %83 = vector.extract_strided_slice %63 {offsets = [0, 15], sizes = [8, 32], strides = [1, 1]} : vector<8x47xf32> to vector<8x32xf32>
    %84 = tpu.concatenate %68, %69, %70, %71, %72, %73, %74, %75, %76, %77, %78, %79, %80, %81, %82, %83 in 0 : vector<8x32xf32>, vector<8x32xf32>, vector<8x32xf32>, vector<8x32xf32>, vector<8x32xf32>, vector<8x32xf32>, vector<8x32xf32>, vector<8x32xf32>, vector<8x32xf32>, vector<8x32xf32>, vector<8x32xf32>, vector<8x32xf32>, vector<8x32xf32>, vector<8x32xf32>, vector<8x32xf32>, vector<8x32xf32> -> vector<128x32xf32>
    %85 = arith.truncf %84 : vector<128x32xf32> to vector<128x32xbf16>
    %cst_28 = arith.constant dense<0.000000e+00> : vector<32x32xf32>
    %86 = tpu.matmul %67, %85, %cst_28 {dimension_numbers = #tpu.dot_dimension_numbers<[1], [0], [0], [1], [0, 0, 1, 1], [], []>} : vector<32x128xbf16>, vector<128x32xbf16>, vector<32x32xf32> -> vector<32x32xf32>
    %87 = arith.addf %66, %86 : vector<32x32xf32>
    %c0_29 = arith.constant 0 : index
    %c0_30 = arith.constant 0 : index
    %88 = vector.load %arg4[%c0_29, %c0_30] : memref<32x120xbf16, #tpu.memory_space<vmem>>, vector<32x120xbf16>
    %89 = vector.extract_strided_slice %65 {offsets = [0, 0], sizes = [8, 32], strides = [1, 1]} : vector<8x47xf32> to vector<8x32xf32>
    %90 = vector.extract_strided_slice %65 {offsets = [0, 1], sizes = [8, 32], strides = [1, 1]} : vector<8x47xf32> to vector<8x32xf32>
    %91 = vector.extract_strided_slice %65 {offsets = [0, 2], sizes = [8, 32], strides = [1, 1]} : vector<8x47xf32> to vector<8x32xf32>
    %92 = vector.extract_strided_slice %65 {offsets = [0, 3], sizes = [8, 32], strides = [1, 1]} : vector<8x47xf32> to vector<8x32xf32>
    %93 = vector.extract_strided_slice %65 {offsets = [0, 4], sizes = [8, 32], strides = [1, 1]} : vector<8x47xf32> to vector<8x32xf32>
    %94 = vector.extract_strided_slice %65 {offsets = [0, 5], sizes = [8, 32], strides = [1, 1]} : vector<8x47xf32> to vector<8x32xf32>
    %95 = vector.extract_strided_slice %65 {offsets = [0, 6], sizes = [8, 32], strides = [1, 1]} : vector<8x47xf32> to vector<8x32xf32>
    %96 = vector.extract_strided_slice %65 {offsets = [0, 7], sizes = [8, 32], strides = [1, 1]} : vector<8x47xf32> to vector<8x32xf32>
    %97 = vector.extract_strided_slice %65 {offsets = [0, 8], sizes = [8, 32], strides = [1, 1]} : vector<8x47xf32> to vector<8x32xf32>
    %98 = vector.extract_strided_slice %65 {offsets = [0, 9], sizes = [8, 32], strides = [1, 1]} : vector<8x47xf32> to vector<8x32xf32>
    %99 = vector.extract_strided_slice %65 {offsets = [0, 10], sizes = [8, 32], strides = [1, 1]} : vector<8x47xf32> to vector<8x32xf32>
    %100 = vector.extract_strided_slice %65 {offsets = [0, 11], sizes = [8, 32], strides = [1, 1]} : vector<8x47xf32> to vector<8x32xf32>
    %101 = vector.extract_strided_slice %65 {offsets = [0, 12], sizes = [8, 32], strides = [1, 1]} : vector<8x47xf32> to vector<8x32xf32>
    %102 = vector.extract_strided_slice %65 {offsets = [0, 13], sizes = [8, 32], strides = [1, 1]} : vector<8x47xf32> to vector<8x32xf32>
    %103 = vector.extract_strided_slice %65 {offsets = [0, 14], sizes = [8, 32], strides = [1, 1]} : vector<8x47xf32> to vector<8x32xf32>
    %104 = tpu.concatenate %89, %90, %91, %92, %93, %94, %95, %96, %97, %98, %99, %100, %101, %102, %103 in 0 : vector<8x32xf32>, vector<8x32xf32>, vector<8x32xf32>, vector<8x32xf32>, vector<8x32xf32>, vector<8x32xf32>, vector<8x32xf32>, vector<8x32xf32>, vector<8x32xf32>, vector<8x32xf32>, vector<8x32xf32>, vector<8x32xf32>, vector<8x32xf32>, vector<8x32xf32>, vector<8x32xf32> -> vector<120x32xf32>
    %105 = arith.truncf %104 : vector<120x32xf32> to vector<120x32xbf16>
    %cst_31 = arith.constant dense<0.000000e+00> : vector<32x32xf32>
    %106 = tpu.matmul %88, %105, %cst_31 {dimension_numbers = #tpu.dot_dimension_numbers<[1], [0], [0], [1], [0, 0, 1, 1], [], []>} : vector<32x120xbf16>, vector<120x32xbf16>, vector<32x32xf32> -> vector<32x32xf32>
    %107 = arith.addf %87, %106 : vector<32x32xf32>
    %c0_32 = arith.constant 0 : index
    %c0_33 = arith.constant 0 : index
    %108 = vector.load %arg5[%c0_32, %c0_33] : memref<32x1xf32, #tpu.memory_space<vmem>>, vector<32x1xf32>
    %109 = vector.broadcast %108 : vector<32x1xf32> to vector<32x32xf32>
    %110 = arith.addf %107, %109 : vector<32x32xf32>
    %111 = arith.truncf %110 : vector<32x32xf32> to vector<32x32xbf16>
    %c1_34 = arith.constant 1 : index
    %c0_35 = arith.constant 0 : index
    %c0_36 = arith.constant 0 : index
    %112 = vector.load %arg6[%c1_34, %c0_35, %c0_36] : memref<2x32x32xbf16, #tpu.memory_space<vmem>>, vector<1x32x32xbf16>
    %113 = vector.shape_cast %112 : vector<1x32x32xbf16> to vector<32x32xbf16>
    %114 = vector.shape_cast %111 : vector<32x32xbf16> to vector<1x32x32xbf16>
    tpu.vector_store %arg6[%c1_34, %c0_35, %c0_36], %114 {strides = array<i32>} : memref<2x32x32xbf16, #tpu.memory_space<vmem>>, vector<1x32x32xbf16>,
    %cst_37 = arith.constant dense<0.000000e+00> : vector<32xf32>
    %115 = vector.multi_reduction <add>, %110, %cst_37 [1] : vector<32x32xf32> to vector<32xf32>
    %116 = vector.shape_cast %115 : vector<32xf32> to vector<32x1xf32>
    %117 = arith.addf %57, %116 : vector<32x1xf32>
    %118 = arith.mulf %110, %110 : vector<32x32xf32>
    %cst_38 = arith.constant dense<0.000000e+00> : vector<32xf32>
    %119 = vector.multi_reduction <add>, %118, %cst_38 [1] : vector<32x32xf32> to vector<32xf32>
    %120 = vector.shape_cast %119 : vector<32xf32> to vector<32x1xf32>
    %121 = arith.addf %61, %120 : vector<32x1xf32>
    %c0_39 = arith.constant 0 : index
    %c0_40 = arith.constant 0 : index
    %122 = vector.load %arg7[%c0_39, %c0_40] : memref<32x1xf32, #tpu.memory_space<vmem>>, vector<32x1xf32>
    tpu.vector_store %arg7[%c0_39, %c0_40], %117 {strides = array<i32>} : memref<32x1xf32, #tpu.memory_space<vmem>>, vector<32x1xf32>,
    %c0_41 = arith.constant 0 : index
    %c0_42 = arith.constant 0 : index
    %123 = vector.load %arg8[%c0_41, %c0_42] : memref<32x1xf32, #tpu.memory_space<vmem>>, vector<32x1xf32>
    tpu.vector_store %arg8[%c0_41, %c0_42], %121 {strides = array<i32>} : memref<32x1xf32, #tpu.memory_space<vmem>>, vector<32x1xf32>,
    return
  }
  func.func @transform_0(%arg0: i32) -> (i32, i32, i32) {
    %c0_i32 = arith.constant 0 : i32
    %c0_i32_0 = arith.constant 0 : i32
    %c0_i32_1 = arith.constant 0 : i32
    %c0_i32_2 = arith.constant 0 : i32
    return %c0_i32, %c0_i32_0, %c0_i32_1 : i32, i32, i32
  }
  func.func @transform_1(%arg0: i32) -> (i32, i32, i32) {
    %c0_i32 = arith.constant 0 : i32
    %c0_i32_0 = arith.constant 0 : i32
    %c0_i32_1 = arith.constant 0 : i32
    %c0_i32_2 = arith.constant 0 : i32
    return %c0_i32, %c0_i32_0, %c0_i32_1 : i32, i32, i32
  }
  func.func @transform_2(%arg0: i32) -> (i32, i32) {
    %c0_i32 = arith.constant 0 : i32
    %c0_i32_0 = arith.constant 0 : i32
    %c0_i32_1 = arith.constant 0 : i32
    return %c0_i32, %c0_i32_0 : i32, i32
  }
  func.func @transform_3(%arg0: i32) -> (i32, i32) {
    %c0_i32 = arith.constant 0 : i32
    %c0_i32_0 = arith.constant 0 : i32
    %c0_i32_1 = arith.constant 0 : i32
    return %c0_i32, %c0_i32_0 : i32, i32
  }
  func.func @transform_4(%arg0: i32) -> (i32, i32) {
    %c0_i32 = arith.constant 0 : i32
    %c0_i32_0 = arith.constant 0 : i32
    %c0_i32_1 = arith.constant 0 : i32
    return %c0_i32, %c0_i32_0 : i32, i32
  }
  func.func @transform_5(%arg0: i32) -> (i32, i32, i32) {
    %c0_i32 = arith.constant 0 : i32
    %c0_i32_0 = arith.constant 0 : i32
    %c0_i32_1 = arith.constant 0 : i32
    %c0_i32_2 = arith.constant 0 : i32
    return %c0_i32, %c0_i32_0, %c0_i32_1 : i32, i32, i32
  }
  func.func @transform_6(%arg0: i32) -> (i32, i32) {
    %c0_i32 = arith.constant 0 : i32
    %c0_i32_0 = arith.constant 0 : i32
    %c0_i32_1 = arith.constant 0 : i32
    return %c0_i32, %c0_i32_0 : i32, i32
  }
  func.func @transform_7(%arg0: i32) -> (i32, i32) {
    %c0_i32 = arith.constant 0 : i32
    %c0_i32_0 = arith.constant 0 : i32
    %c0_i32_1 = arith.constant 0 : i32
    return %c0_i32, %c0_i32_0 : i32, i32
  }
}

</mosaic_0001>

<bundles_post_ra>
// kernel: tpu_custom_call.1
= control target key start
LH: loop header
LB: loop body
LE: loop exit
PB: predicated region body
PF: predicated region fallthrough
CT: control target
= control target key end

     0   :  { %13 = vsyncpa [#allocation3], 0  ;;  %s1383_s0 = inlined_call_operand.vmem [shape: f32[2,8,47], index: 0, kind: input, shape index: {}]   ;;  %s1384_s1 = inlined_call_operand.vmem [shape: f32[2,8,47], index: 1, kind: input, shape index: {}]   ;;  %s1385_s2 = inlined_call_operand.hbm [shape: bf16[32,128], index: 2, kind: input, shape index: {}]   ;;  %s1386_s3 = inlined_call_operand.hbm [shape: bf16[32,120], index: 3, kind: input, shape index: {}]   ;;  %s1387_s4 = inlined_call_operand.vmem [shape: f32[32,1], index: 4, kind: input, shape index: {}]   ;;  %s1388_s5 = inlined_call_operand.hbm [shape: bf16[2,32,32], index: 5, kind: output, shape index: {0}]   ;;  %s1389_s6 = inlined_call_operand.vmem [shape: f32[32,1], index: 6, kind: output, shape index: {1}]   ;;  %s1390_s7 = inlined_call_operand.vmem [shape: f32[32,1], index: 7, kind: output, shape index: {2}]  }
   0x1   :  { %14 = vsyncpa [#allocation6], 0 }
   0x2   :  { %15 = vsyncpa [#allocation4], 0  ;;  %s1159_s24 = smov [#allocation2]   ;;  %s1087_s28 = scalar_lea.hbm %s1385_s2, 256 }
   0x3   :  { %s25_s25 = sshll.u32 %s1159_s24, 4  ;;  %p1088_p0 = scmp.ne.s32.totalorder %s1385_s2, %s1087_s28  ;;  %s26_s25 = int_to_ptr.vmem [resolvable:$true] %s25_s25 }
   0x4   :  { %p1091_p1 = scmp.lt.u32.totalorder %s1087_s28, %s1385_s2 }
   0x6   :  { %p1093_p2 = pnand %p1091_p1, %p1088_p0 }
   0x8   :  { %1096 = shalt.err (!%p1093_p2)
}
   0x9   :  { %s1097_s10 = scalar_lea.vmem %s26_s25, 256  ;;  %p1102_p4 = scmp.lt.s32.totalorder %s26_s25, %s26_s25 }
   0xa   :  { %p1098_p3 = scmp.ne.s32.totalorder %s26_s25, %s1097_s10  ;;  %p1103_p5 = scmp.lt.s32.totalorder %s1097_s10, %s1097_s10 }
   0xc   :  { %p1104_p6 = por %p1103_p5, %p1102_p4 }
   0xe   :  { %p1105_p7 = pnand %p1104_p6, %p1098_p3 }
  0x10   :  { %1108 = shalt.err (!%p1105_p7)
}
  0x11   :  { %s1160_s11 = smov 64   ;;  %s1161_s12 = smov 4  }
  0x12   :  { %31 = dma.hbm_to_vmem [thread:$0]  %s1385_s2, 256, %s26_s25, [#allocation3], %s1160_s11, %s1160_s11, %s1161_s12  }
  0x13   :  { %s1162_s15 = smov [#allocation5]   ;;  %s1109_s19 = scalar_lea.hbm %s1386_s3, 256 }
  0x14   :  { %s37_s16 = sshll.u32 %s1162_s15, 4  ;;  %p1110_p8 = scmp.ne.s32.totalorder %s1386_s3, %s1109_s19  ;;  %s38_s16 = int_to_ptr.vmem [resolvable:$true] %s37_s16 }
  0x15   :  { %p1113_p9 = scmp.lt.u32.totalorder %s1109_s19, %s1386_s3 }
  0x17   :  { %p1115_p10 = pnand %p1113_p9, %p1110_p8 }
  0x19   :  { %1118 = shalt.err (!%p1115_p10)
}
  0x1a   :  { %s1119_s24 = scalar_lea.vmem %s38_s16, 256  ;;  %p1124_p12 = scmp.lt.s32.totalorder %s38_s16, %s38_s16 }
  0x1b   :  { %p1120_p11 = scmp.ne.s32.totalorder %s38_s16, %s1119_s24  ;;  %p1125_p13 = scmp.lt.s32.totalorder %s1119_s24, %s1119_s24 }
  0x1d   :  { %p1126_p0 = por %p1125_p13, %p1124_p12 }
  0x1f   :  { %p1127_p1 = pnand %p1126_p0, %p1120_p11 }
  0x21   :  { %1130 = shalt.err (!%p1127_p1)
}
  0x22   :  { %43 = dma.hbm_to_vmem [thread:$0]  %s1386_s3, 256, %s38_s16, [#allocation6], %s1160_s11, %s1160_s11, %s1161_s12  }
  0x23   :  { %1153 = dma.done.wait [#allocation3], 256  }
  0x24   :  { %1154 = vsyncadd [#allocation3], 4294967040 }
  0x25   :  { %1155 = dma.done.wait [#allocation6], 256  }
  0x26   :  { %1156 = vsyncadd [#allocation6], 4294967040  ;;  %v1253_v0 = vld [vmem:[%s1384_s1] sm:$0xff]  ;;  %v1258_v1 = vld [vmem:[%s1384_s1 + $0x8] sm:$0xff]  ;;  %s1163_s30 = smov 127   ;;  %s1164_s3 = smov 125  }
  0x27   :  { %v932_v2 = vpack.i.bf16 %v1258_v1, %v1253_v0  ;;  %s1165_s8 = smov 126   ;;  %s1166_s9 = smov 124   ;;  %v1272_v3 = vld [vmem:[%s1383_s0] sm:$0xff]  ;;  %v1277_v4 = vld [vmem:[%s1383_s0 + $0x8] sm:$0xff]  ;;  %v1079_v5 = vld [vmem:[#allocation5] sm:$0xff]   ;;  %vm178_vm0 = vcmask 982016  }
  0x28   :  { %s1167_s10 = smov 123   ;;  %s1168_s1 = smov 122   ;;  %v1080_v6 = vld [vmem:[#allocation5] sm:$0xff]   ;;  %837 = vmatprep.mubr.msk.bf16.mxu0 %vm178_vm0, %v1079_v5  ;;  %v1002_v7 = vpack.i.bf16 %v1277_v4, %v1272_v3  ;;  %v299_v8 = vld [vmem:[%s1387_s4] sm:$0xff]  ;;  %v1178_v9 = vmov 0   ;;  %v632_v10 = vld [vmem:[%s1387_s4 + $0x8] sm:$0xff] }
  0x29   :  { %933 = vrot.lane.b32.xlu0 %v932_v2, %s1163_s30  ;;  %943 = vrot.lane.b32.xlu1 %v932_v2, %s1164_s3  ;;  %s1169_s13 = smov 121   ;;  %s1170_s14 = smov 120   ;;  %v301_v11 = vld [vmem:[%s1387_s4 + $0x10] sm:$0xff]  ;;  %v302_v12 = vld [vmem:[%s1387_s4 + $0x18] sm:$0xff]  ;;  %vm185_vm1 = vcmask 1043456   ;;  %vm343_vm2 = vcmask 257024  }
  0x2a   :  { %s1171_s15 = smov 119   ;;  %s1172_s16 = smov 118   ;;  %877 = vmatprep.mubr.msk.bf16.mxu1 %vm178_vm0, %v1080_v6  ;;  %1077 = vset.pattern.permute.xlu1 %v1178_v9  ;;  %vm348_vm3 = vcmask 261120  }
  0x2b   :  { %s1173_s17 = smov 117   ;;  %s1174_s18 = smov 116   ;;  %1078 = vset.pattern.permute.xlu0 %v1178_v9 }
  0x2c   :  { %s1175_s23 = smov 115   ;;  %s1176_s24 = smov 114  }
  0x2d   :  { %938 = vrot.lane.b32.xlu0 %v932_v2, %s1165_s8  ;;  %948 = vrot.lane.b32.xlu1 %v932_v2, %s1166_s9  ;;  %s1177_s25 = smov 113   ;;  %s1179_s4 = smov [#allocation7]  }
  0x31   :  { %953 = vrot.lane.b32.xlu0 %v932_v2, %s1167_s10  ;;  %958 = vrot.lane.b32.xlu1 %v932_v2, %s1168_s1 }
  0x35   :  { %963 = vrot.lane.b32.xlu0 %v932_v2, %s1169_s13  ;;  %968 = vrot.lane.b32.xlu1 %v932_v2, %s1170_s14 }
  0x39   :  { %973 = vrot.lane.b32.xlu0 %v932_v2, %s1171_s15  ;;  %978 = vrot.lane.b32.xlu1 %v932_v2, %s1172_s16 }
  0x3d   :  { %983 = vrot.lane.b32.xlu0 %v932_v2, %s1173_s17  ;;  %988 = vrot.lane.b32.xlu1 %v932_v2, %s1174_s18 }
  0x41   :  { %993 = vrot.lane.b32.xlu0 %v932_v2, %s1175_s23  ;;  %998 = vrot.lane.b32.xlu1 %v932_v2, %s1176_s24 }
  0x45   :  { %1003 = vrot.lane.b32.xlu0 %v1002_v7, %s1163_s30  ;;  %1008 = vrot.lane.b32.xlu1 %v1002_v7, %s1165_s8  ;;  %s730_s8 = sshll.u32 %s1179_s4, 4  ;;  %s731_s8 = int_to_ptr.vmem [resolvable:$true] %s730_s8 }
  0x46   :  { %p1136_p3 = scmp.lt.s32.totalorder %s731_s8, %s731_s8 }
  0x49   :  { %1013 = vrot.lane.b32.xlu0 %v1002_v7, %s1164_s3  ;;  %1018 = vrot.lane.b32.xlu1 %v1002_v7, %s1166_s9  ;;  %s1131_s9 = scalar_lea.vmem %s731_s8, 512 }
  0x4a   :  { %p1132_p2 = scmp.ne.s32.totalorder %s731_s8, %s1131_s9  ;;  %p1137_p4 = scmp.lt.s32.totalorder %s1131_s9, %s1131_s9 }
  0x4c   :  { %p1138_p5 = por %p1137_p4, %p1136_p3 }
  0x4d   :  { %1023 = vrot.lane.b32.xlu0 %v1002_v7, %s1167_s10  ;;  %1028 = vrot.lane.b32.xlu1 %v1002_v7, %s1168_s1 }
  0x4e   :  { %p1139_p6 = pnand %p1138_p5, %p1132_p2 }
  0x51   :  { %1033 = vrot.lane.b32.xlu0 %v1002_v7, %s1169_s13  ;;  %1038 = vrot.lane.b32.xlu1 %v1002_v7, %s1170_s14 }
  0x55   :  { %1043 = vrot.lane.b32.xlu0 %v1002_v7, %s1171_s15  ;;  %1048 = vrot.lane.b32.xlu1 %v1002_v7, %s1172_s16 }
  0x59   :  { %1053 = vrot.lane.b32.xlu0 %v1002_v7, %s1173_s17  ;;  %1058 = vrot.lane.b32.xlu1 %v1002_v7, %s1174_s18 }
  0x5d   :  { %1063 = vrot.lane.b32.xlu0 %v1002_v7, %s1175_s23  ;;  %1068 = vrot.lane.b32.xlu1 %v1002_v7, %s1176_s24 }
  0x61   :  { %1073 = vrot.lane.b32.xlu0 %v1002_v7, %s1177_s25  ;;  %305 = vperm.xlu1 %1077, %v299_v8  }
  0x65   :  { %310 = vperm.xlu0 %1078, %v632_v10   ;;  %315 = vperm.xlu1 %1077, %v301_v11  }
  0x69   :  { %637 = vperm.xlu0 %1078, %v299_v8   ;;  %320 = vperm.xlu1 %1077, %v302_v12  }
  0x6d   :  { %647 = vperm.xlu0 %1078, %v301_v11   ;;  %642 = vperm.xlu1 %1077, %v632_v10  }
  0x71   :  { %652 = vperm.xlu1 %1077, %v302_v12  }
  0x9b   :  { %v934_v13 = vpop.permute.xlu0 %933  ;;  %v944_v14 = vpop.permute.xlu1 %943 }
  0x9c   :  { %v936_v15 = vunpack.i.h.bf16 %v934_v13  ;;  %v935_v16 = vunpack.i.l.bf16 %v934_v13  ;;  %v946_v17 = vunpack.i.h.bf16 %v944_v14  ;;  %v945_v18 = vunpack.i.l.bf16 %v944_v14 }
  0x9e   :  { %v160_v19 = vpack.c.bf16 %v935_v16, %v1253_v0  ;;  %v494_v20 = vpack.c.bf16 %v936_v15, %v1258_v1 }
  0x9f   :  { %v939_v21 = vpop.permute.xlu0 %938  ;;  %v949_v22 = vpop.permute.xlu1 %948 }
  0xa0   :  { %v941_v23 = vunpack.i.h.bf16 %v939_v21  ;;  %v940_v24 = vunpack.i.l.bf16 %v939_v21  ;;  %821 = vmatprep.subr.bf16.mxu0 %v160_v19  ;;  %861 = vmatprep.subr.bf16.mxu1 %v494_v20  ;;  %v951_v27 = vunpack.i.h.bf16 %v949_v22  ;;  %v950_v28 = vunpack.i.l.bf16 %v949_v22 }
  0xa1   :  { %822 = vmatpush3.bf16.msra.mxu0 %v160_v19  ;;  %862 = vmatpush3.bf16.msra.mxu1 %v494_v20 }
  0xa2   :  { %v495_v25 = vpack.c.bf16 %v946_v17, %v941_v23  ;;  %v161_v26 = vpack.c.bf16 %v945_v18, %v940_v24  ;;  %v1081_v23 = vld [vmem:[#allocation5 + $0x8] sm:$0xff]  }
  0xa3   :  { %v954_v29 = vpop.permute.xlu0 %953  ;;  %v959_v30 = vpop.permute.xlu1 %958  ;;  %v1082_v24 = vld [vmem:[#allocation5 + $0x8] sm:$0xff]  }
  0xa4   :  { %v956_v31 = vunpack.i.h.bf16 %v954_v29  ;;  %v955_v32 = vunpack.i.l.bf16 %v954_v29  ;;  %823 = vmatprep.subr.bf16.mxu0 %v161_v26  ;;  %863 = vmatprep.subr.bf16.mxu1 %v495_v25  ;;  %v961_v35 = vunpack.i.h.bf16 %v959_v30  ;;  %v960_v36 = vunpack.i.l.bf16 %v959_v30  ;;  %v1083_v29 = vld [vmem:[#allocation2] sm:$0xff]  }
  0xa5   :  { %824 = vmatpush3.bf16.msra.mxu0 %v161_v26  ;;  %864 = vmatpush3.bf16.msra.mxu1 %v495_v25  ;;  %v1084_v30 = vld [vmem:[#allocation2] sm:$0xff]  }
  0xa6   :  { %v496_v33 = vpack.c.bf16 %v956_v31, %v951_v27  ;;  %v162_v34 = vpack.c.bf16 %v955_v32, %v950_v28 }
  0xa7   :  { %v964_v37 = vpop.permute.xlu0 %963  ;;  %v969_v38 = vpop.permute.xlu1 %968 }
  0xa8   :  { %v966_v39 = vunpack.i.h.bf16 %v964_v37  ;;  %v965_v40 = vunpack.i.l.bf16 %v964_v37  ;;  %825 = vmatprep.subr.bf16.mxu0 %v162_v34  ;;  %865 = vmatprep.subr.bf16.mxu1 %v496_v33  ;;  %v971_v43 = vunpack.i.h.bf16 %v969_v38  ;;  %v970_v44 = vunpack.i.l.bf16 %v969_v38 }
  0xa9   :  { %826 = vmatpush3.bf16.msra.mxu0 %v162_v34  ;;  %866 = vmatpush3.bf16.msra.mxu1 %v496_v33 }
  0xaa   :  { %v497_v41 = vpack.c.bf16 %v966_v39, %v961_v35  ;;  %v163_v42 = vpack.c.bf16 %v965_v40, %v960_v36 }
  0xab   :  { %v974_v45 = vpop.permute.xlu0 %973  ;;  %v979_v46 = vpop.permute.xlu1 %978 }
  0xac   :  { %v976_v47 = vunpack.i.h.bf16 %v974_v45  ;;  %v975_v48 = vunpack.i.l.bf16 %v974_v45  ;;  %827 = vmatprep.subr.bf16.mxu0 %v163_v42  ;;  %867 = vmatprep.subr.bf16.mxu1 %v497_v41  ;;  %v981_v51 = vunpack.i.h.bf16 %v979_v46  ;;  %v980_v52 = vunpack.i.l.bf16 %v979_v46 }
  0xad   :  { %828 = vmatpush3.bf16.msra.mxu0 %v163_v42  ;;  %868 = vmatpush3.bf16.msra.mxu1 %v497_v41 }
  0xae   :  { %v498_v49 = vpack.c.bf16 %v976_v47, %v971_v43  ;;  %v164_v50 = vpack.c.bf16 %v975_v48, %v970_v44 }
  0xaf   :  { %v984_v53 = vpop.permute.xlu0 %983  ;;  %v989_v54 = vpop.permute.xlu1 %988 }
  0xb0   :  { %v986_v55 = vunpack.i.h.bf16 %v984_v53  ;;  %v985_v56 = vunpack.i.l.bf16 %v984_v53  ;;  %829 = vmatprep.subr.bf16.mxu0 %v164_v50  ;;  %869 = vmatprep.subr.bf16.mxu1 %v498_v49  ;;  %v991_v59 = vunpack.i.h.bf16 %v989_v54  ;;  %v990_v60 = vunpack.i.l.bf16 %v989_v54 }
  0xb1   :  { %830 = vmatpush3.bf16.msra.mxu0 %v164_v50  ;;  %870 = vmatpush3.bf16.msra.mxu1 %v498_v49 }
  0xb2   :  { %v499_v57 = vpack.c.bf16 %v986_v55, %v981_v51  ;;  %v165_v58 = vpack.c.bf16 %v985_v56, %v980_v52 }
  0xb3   :  { %v994_v61 = vpop.permute.xlu0 %993  ;;  %v999_v62 = vpop.permute.xlu1 %998 }
  0xb4   :  { %v996_v63 = vunpack.i.h.bf16 %v994_v61  ;;  %v995_v0 = vunpack.i.l.bf16 %v994_v61  ;;  %831 = vmatprep.subr.bf16.mxu0 %v165_v58  ;;  %871 = vmatprep.subr.bf16.mxu1 %v499_v57  ;;  %v1001_v1 = vunpack.i.h.bf16 %v999_v62  ;;  %v1000_v2 = vunpack.i.l.bf16 %v999_v62 }
  0xb5   :  { %832 = vmatpush3.bf16.msra.mxu0 %v165_v58  ;;  %872 = vmatpush3.bf16.msra.mxu1 %v499_v57 }
  0xb6   :  { %v500_v5 = vpack.c.bf16 %v996_v63, %v991_v59  ;;  %v166_v6 = vpack.c.bf16 %v995_v0, %v990_v60  ;;  %v501_v7 = vpack.c.bf16 %v1001_v1, %v1001_v1  ;;  %v167_v8 = vpack.c.bf16 %v1000_v2, %v1000_v2 }
  0xb7   :  { %v1004_v9 = vpop.permute.xlu0 %1003  ;;  %v1009_v10 = vpop.permute.xlu1 %1008 }
  0xb8   :  { %833 = vmatprep.subr.bf16.mxu0 %v166_v6  ;;  %873 = vmatprep.subr.bf16.mxu1 %v500_v5  ;;  %v1006_v11 = vunpack.i.h.bf16 %v1004_v9  ;;  %v1005_v12 = vunpack.i.l.bf16 %v1004_v9  ;;  %v187_v13 = vsel %vm185_vm1, %v167_v8, 0  ;;  %v519_v14 = vsel %vm185_vm1, %v501_v7, 0 }
  0xb9   :  { %834 = vmatpush3.bf16.msra.mxu0 %v166_v6  ;;  %874 = vmatpush3.bf16.msra.mxu1 %v500_v5  ;;  %v1011_v17 = vunpack.i.h.bf16 %v1009_v10  ;;  %v1010_v18 = vunpack.i.l.bf16 %v1009_v10 }
  0xba   :  { %v439_v15 = vpack.c.bf16 %v1006_v11, %v1277_v4  ;;  %v105_v16 = vpack.c.bf16 %v1005_v12, %v1272_v3  ;;  %909 = vmatprep.subr.msk.bf16.mxu0 %vm185_vm1, %v167_v8  ;;  %910 = vmatprep.subr.msk.bf16.mxu1 %vm185_vm1, %v501_v7  ;;  %v1085_v12 = vld [vmem:[#allocation2 + $0x8] sm:$0xff]  }
  0xbb   :  { %v1014_v19 = vpop.permute.xlu0 %1013  ;;  %v1019_v20 = vpop.permute.xlu1 %1018 }
  0xbc   :  { %v1016_v21 = vunpack.i.h.bf16 %v1014_v19  ;;  %v1015_v22 = vunpack.i.l.bf16 %v1014_v19  ;;  %v1021_v4 = vunpack.i.h.bf16 %v1019_v20  ;;  %v1020_v3 = vunpack.i.l.bf16 %v1019_v20 }
  0xbd   :  { %836 = vmatpush3.bf16.msra.mxu0 %v187_v13  ;;  %876 = vmatpush3.bf16.msra.mxu1 %v519_v14  ;;  %v1086_v13 = vld [vmem:[#allocation2 + $0x8] sm:$0xff]  }
  0xbe   :  { %v440_v25 = vpack.c.bf16 %v1016_v21, %v1011_v17  ;;  %v106_v26 = vpack.c.bf16 %v1015_v22, %v1010_v18  ;;  %841 = vmatprep.subr.bf16.mxu0 %v105_v16  ;;  %881 = vmatprep.subr.bf16.mxu1 %v439_v15 }
  0xbf   :  { %v1024_v27 = vpop.permute.xlu0 %1023  ;;  %v1029_v28 = vpop.permute.xlu1 %1028 }
  0xc0   :  { %838 = vmatmul.mubr.msk.bf16.vlgmr.msra.gmra.mrb[0].mxu0 %vm178_vm0, %v1081_v23  ;;  %878 = vmatmul.mubr.msk.bf16.vlgmr.msra.gmra.mrb[0].mxu1 %vm178_vm0, %v1082_v24  ;;  %v1026_v31 = vunpack.i.h.bf16 %v1024_v27  ;;  %v1025_v32 = vunpack.i.l.bf16 %v1024_v27  ;;  %v1031_v35 = vunpack.i.h.bf16 %v1029_v28  ;;  %v1030_v36 = vunpack.i.l.bf16 %v1029_v28 }
  0xc1   :  { %842 = vmatpush3.bf16.msra.mxu0 %v105_v16  ;;  %882 = vmatpush3.bf16.msra.mxu1 %v439_v15 }
  0xc2   :  { %v441_v33 = vpack.c.bf16 %v1026_v31, %v1021_v4  ;;  %v107_v34 = vpack.c.bf16 %v1025_v32, %v1020_v3  ;;  %843 = vmatprep.subr.bf16.mxu0 %v106_v26  ;;  %883 = vmatprep.subr.bf16.mxu1 %v440_v25 }
  0xc3   :  { %v1034_v37 = vpop.permute.xlu0 %1033  ;;  %v1039_v38 = vpop.permute.xlu1 %1038  ;;  %857 = vmatprep.mubr.bf16.mxu0 %v1083_v29  ;;  %897 = vmatprep.mubr.bf16.mxu1 %v1084_v30 }
  0xc4   :  { %v1036_v39 = vunpack.i.h.bf16 %v1034_v37  ;;  %v1035_v40 = vunpack.i.l.bf16 %v1034_v37  ;;  %v1041_v43 = vunpack.i.h.bf16 %v1039_v38  ;;  %v1040_v44 = vunpack.i.l.bf16 %v1039_v38 }
  0xc5   :  { %844 = vmatpush3.bf16.msra.mxu0 %v106_v26  ;;  %884 = vmatpush3.bf16.msra.mxu1 %v440_v25 }
  0xc6   :  { %v442_v41 = vpack.c.bf16 %v1036_v39, %v1031_v35  ;;  %v108_v42 = vpack.c.bf16 %v1035_v40, %v1030_v36  ;;  %845 = vmatprep.subr.bf16.mxu0 %v107_v34  ;;  %885 = vmatprep.subr.bf16.mxu1 %v441_v33 }
  0xc7   :  { %v1044_v45 = vpop.permute.xlu0 %1043  ;;  %v1049_v46 = vpop.permute.xlu1 %1048 }
  0xc8   :  { %v1046_v47 = vunpack.i.h.bf16 %v1044_v45  ;;  %v1045_v48 = vunpack.i.l.bf16 %v1044_v45  ;;  %v1051_v51 = vunpack.i.h.bf16 %v1049_v46  ;;  %v1050_v52 = vunpack.i.l.bf16 %v1049_v46 }
  0xc9   :  { %846 = vmatpush3.bf16.msra.mxu0 %v107_v34  ;;  %886 = vmatpush3.bf16.msra.mxu1 %v441_v33 }
  0xca   :  { %v443_v49 = vpack.c.bf16 %v1046_v47, %v1041_v43  ;;  %v109_v50 = vpack.c.bf16 %v1045_v48, %v1040_v44  ;;  %847 = vmatprep.subr.bf16.mxu0 %v108_v42  ;;  %887 = vmatprep.subr.bf16.mxu1 %v442_v41 }
  0xcb   :  { %v1054_v53 = vpop.permute.xlu0 %1053  ;;  %v1059_v54 = vpop.permute.xlu1 %1058 }
  0xcc   :  { %v1056_v55 = vunpack.i.h.bf16 %v1054_v53  ;;  %v1055_v56 = vunpack.i.l.bf16 %v1054_v53  ;;  %v1061_v59 = vunpack.i.h.bf16 %v1059_v54  ;;  %v1060_v60 = vunpack.i.l.bf16 %v1059_v54 }
  0xcd   :  { %848 = vmatpush3.bf16.msra.mxu0 %v108_v42  ;;  %888 = vmatpush3.bf16.msra.mxu1 %v442_v41 }
  0xce   :  { %v444_v57 = vpack.c.bf16 %v1056_v55, %v1051_v51  ;;  %v110_v58 = vpack.c.bf16 %v1055_v56, %v1050_v52  ;;  %849 = vmatprep.subr.bf16.mxu0 %v109_v50  ;;  %889 = vmatprep.subr.bf16.mxu1 %v443_v49 }
  0xcf   :  { %v1064_v61 = vpop.permute.xlu0 %1063  ;;  %v1069_v62 = vpop.permute.xlu1 %1068 }
  0xd0   :  { %v1066_v63 = vunpack.i.h.bf16 %v1064_v61  ;;  %v1065_v0 = vunpack.i.l.bf16 %v1064_v61  ;;  %v1071_v5 = vunpack.i.h.bf16 %v1069_v62  ;;  %v1070_v6 = vunpack.i.l.bf16 %v1069_v62 }
  0xd1   :  { %850 = vmatpush3.bf16.msra.mxu0 %v109_v50  ;;  %890 = vmatpush3.bf16.msra.mxu1 %v443_v49 }
  0xd2   :  { %v445_v1 = vpack.c.bf16 %v1066_v63, %v1061_v59  ;;  %v111_v2 = vpack.c.bf16 %v1065_v0, %v1060_v60  ;;  %851 = vmatprep.subr.bf16.mxu0 %v110_v58  ;;  %891 = vmatprep.subr.bf16.mxu1 %v444_v57 }
  0xd3   :  { %v1074_v7 = vpop.permute.xlu0 %1073 }
  0xd4   :  { %v1076_v8 = vunpack.i.h.bf16 %v1074_v7  ;;  %v1075_v9 = vunpack.i.l.bf16 %v1074_v7 }
  0xd5   :  { %852 = vmatpush3.bf16.msra.mxu0 %v110_v58  ;;  %892 = vmatpush3.bf16.msra.mxu1 %v444_v57 }
  0xd6   :  { %v446_v10 = vpack.c.bf16 %v1076_v8, %v1071_v5  ;;  %v112_v11 = vpack.c.bf16 %v1075_v9, %v1070_v6  ;;  %853 = vmatprep.subr.bf16.mxu0 %v111_v2  ;;  %893 = vmatprep.subr.bf16.mxu1 %v445_v1 }
  0xd9   :  { %854 = vmatpush3.bf16.msra.mxu0 %v111_v2  ;;  %894 = vmatpush3.bf16.msra.mxu1 %v445_v1 }
  0xda   :  { %855 = vmatprep.subr.bf16.mxu0 %v112_v11  ;;  %895 = vmatprep.subr.bf16.mxu1 %v446_v10 }
  0xdd   :  { %856 = vmatpush3.bf16.msra.mxu0 %v112_v11  ;;  %896 = vmatpush3.bf16.msra.mxu1 %v446_v10 }
  0xe0   :  { %858 = vmatmul.mubr.bf16.vlgmr.msra.gmra.mrb[0].mxu0 %v1085_v12  ;;  %898 = vmatmul.mubr.bf16.vlgmr.msra.gmra.mrb[0].mxu1 %v1086_v13  ;;  %v306_v14 = vpop.permute.xlu1 %305 }
  0xe4   :  { %v316_v15 = vpop.permute.xlu1 %315  ;;  %v311_v16 = vpop.permute.xlu0 %310 }
  0xe8   :  { %v321_v17 = vpop.permute.xlu1 %320  ;;  %v638_v18 = vpop.permute.xlu0 %637 }
  0xec   :  { %v643_v19 = vpop.permute.xlu1 %642  ;;  %v648_v20 = vpop.permute.xlu0 %647 }
  0xf0   :  { %v653_v21 = vpop.permute.xlu1 %652 }
 0x1b3   :  { %v859_v22 = vpop.f32.mrb[0].mxu0  ;;  %v899_v23 = vpop.f32.mrb[0].mxu1 }
 0x1b4   :  { %v325_v24 = vadd.f32 %v859_v22, %v316_v15  ;;  %v657_v25 = vadd.f32 %v899_v23, %v648_v20  ;;  %v284_v26 = vpop.f32.mrb[1].mxu0  ;;  %v616_v4 = vpop.f32.mrb[1].mxu1 }
 0x1b5   :  { %v323_v3 = vadd.f32 %v306_v14, %v284_v26  ;;  %v655_v27 = vadd.f32 %v638_v18, %v616_v4  ;;  %v860_v28 = vpop.f32.mrb[2].mxu0  ;;  %v900_v29 = vpop.f32.mrb[2].mxu1 }
 0x1b6   :  { %v775_v30 = vpack.c.bf16 %v325_v24, %v325_v24  ;;  %v779_v31 = vpack.c.bf16 %v657_v25, %v657_v25  ;;  %v326_v32 = vadd.f32 %v860_v28, %v321_v17  ;;  %v658_v33 = vadd.f32 %v900_v29, %v653_v21  ;;  %v287_v34 = vpop.f32.mrb[3].mxu0  ;;  %v619_v35 = vpop.f32.mrb[3].mxu1 }
 0x1b7   :  { %v773_v36 = vpack.c.bf16 %v323_v3, %v323_v3  ;;  %v777_v37 = vpack.c.bf16 %v655_v27, %v655_v27  ;;  %v324_v38 = vadd.f32 %v311_v16, %v287_v34  ;;  %v656_v39 = vadd.f32 %v643_v19, %v619_v35 }
 0x1b8   :  { %346 = vst.msk [vmem:[#allocation7 + $0x8] sm:$0xf] %vm343_vm2, %v775_v30  ;;  %678 = vst.msk [vmem:[#allocation7 + $0x18] sm:$0xf] %vm343_vm2, %v779_v31  ;;  %v776_v40 = vpack.c.bf16 %v326_v32, %v326_v32  ;;  %v780_v41 = vpack.c.bf16 %v658_v33, %v658_v33  ;;  %v686_v42 = vsel %vm348_vm3, %v657_v25, 0.0  ;;  %v355_v43 = vsel %vm348_vm3, %v325_v24, 0.0 }
 0x1b9   :  { %344 = vst.msk [vmem:[#allocation7] sm:$0xf] %vm343_vm2, %v773_v36  ;;  %676 = vst.msk [vmem:[#allocation7 + $0x10] sm:$0xf] %vm343_vm2, %v777_v37  ;;  %v774_v44 = vpack.c.bf16 %v324_v38, %v324_v38  ;;  %v778_v45 = vpack.c.bf16 %v656_v39, %v656_v39  ;;  %687 = vadd.xlane.f32.xlu1 %v686_v42  ;;  %356 = vadd.xlane.f32.xlu0 %v355_v43  ;;  %v680_v46 = vsel %vm348_vm3, %v655_v27, 0.0 }
 0x1ba   :  { %347 = vst.msk [vmem:[#allocation7 + $0xc] sm:$0xf] %vm343_vm2, %v776_v40  ;;  %679 = vst.msk [vmem:[#allocation7 + $0x1c] sm:$0xf] %vm343_vm2, %v780_v41  ;;  %v349_v47 = vsel %vm348_vm3, %v323_v3, 0.0  ;;  %v367_v48 = vmul.f32 %v325_v24, %v325_v24  ;;  %v358_v50 = vsel %vm348_vm3, %v326_v32, 0.0  ;;  %v365_v53 = vmul.f32 %v323_v3, %v323_v3 }
 0x1bb   :  { %345 = vst.msk [vmem:[#allocation7 + $0x4] sm:$0xf] %vm343_vm2, %v774_v44  ;;  %677 = vst.msk [vmem:[#allocation7 + $0x14] sm:$0xf] %vm343_vm2, %v778_v45  ;;  %v689_v51 = vsel %vm348_vm3, %v658_v33, 0.0  ;;  %v352_v52 = vsel %vm348_vm3, %v324_v38, 0.0  ;;  %v368_v56 = vmul.f32 %v326_v32, %v326_v32  ;;  %v696_v57 = vmul.f32 %v655_v27, %v655_v27 }
 0x1bc   :  { %v375_v49 = vsel %vm348_vm3, %v367_v48, 0.0  ;;  %v683_v54 = vsel %vm348_vm3, %v656_v39, 0.0  ;;  %v369_v55 = vsel %vm348_vm3, %v365_v53, 0.0  ;;  %v366_v60 = vmul.f32 %v324_v38, %v324_v38 }
 0x1bd   :  { %681 = vadd.xlane.f32.xlu1 %v680_v46  ;;  %350 = vadd.xlane.f32.xlu0 %v349_v47  ;;  %v378_v58 = vsel %vm348_vm3, %v368_v56, 0.0  ;;  %v700_v59 = vsel %vm348_vm3, %v696_v57, 0.0  ;;  %v698_v61 = vmul.f32 %v657_v25, %v657_v25  ;;  %v697_v0 = vmul.f32 %v656_v39, %v656_v39 }
 0x1be   :  { %v372_v62 = vsel %vm348_vm3, %v366_v60, 0.0  ;;  %v699_v2 = vmul.f32 %v658_v33, %v658_v33 }
 0x1bf   :  { %v706_v63 = vsel %vm348_vm3, %v698_v61, 0.0  ;;  %v703_v1 = vsel %vm348_vm3, %v697_v0, 0.0 }
 0x1c0   :  { %v709_v5 = vsel %vm348_vm3, %v699_v2, 0.0 }
 0x1c1   :  { %376 = vadd.xlane.f32.xlu1 %v375_v49  ;;  %359 = vadd.xlane.f32.xlu0 %v358_v50 }
 0x1c5   :  { %690 = vadd.xlane.f32.xlu0 %v689_v51  ;;  %353 = vadd.xlane.f32.xlu1 %v352_v52 }
 0x1c9   :  { %684 = vadd.xlane.f32.xlu0 %v683_v54  ;;  %370 = vadd.xlane.f32.xlu1 %v369_v55 }
 0x1cd   :  { %379 = vadd.xlane.f32.xlu0 %v378_v58  ;;  %701 = vadd.xlane.f32.xlu1 %v700_v59 }
 0x1d1   :  { %373 = vadd.xlane.f32.xlu0 %v372_v62  ;;  %707 = vadd.xlane.f32.xlu1 %v706_v63 }
 0x1d5   :  { %704 = vadd.xlane.f32.xlu0 %v703_v1 }
 0x1d9   :  { %710 = vadd.xlane.f32.xlu0 %v709_v5 }
 0x1da   :  { %1142 = shalt.err (!%p1139_p6)
}
 0x1db   :  { %s1143_s13 = scalar_lea.hbm %s1388_s5, 512 }
 0x1dc   :  { %p1144_p7 = scmp.ne.s32.totalorder %s1388_s5, %s1143_s13  ;;  %p1147_p8 = scmp.lt.u32.totalorder %s1143_s13, %s1388_s5 }
 0x1de   :  { %p1149_p9 = pnand %p1147_p8, %p1144_p7 }
 0x1e0   :  { %1152 = shalt.err (!%p1149_p9)
}
 0x1e1   :  { %736 = dma.vmem_to_hbm [thread:$0]  %s731_s8, 512, %s1388_s5, [#allocation4], %s1160_s11, %s1160_s11, %s1161_s12   ;;  %vm716_vm4 = vcmask 7168  }
 0x246   :  { %v688_v6 = vpop.xlane.xlu1 %687  ;;  %v357_v7 = vpop.xlane.xlu0 %356 }
 0x247   :  { %v694_v8 = vadd.f32 %v688_v6, %v357_v7 }
 0x249   :  { %719 = vst.msk [vmem:[%s1389_s6 + $0x10] sm:$0xff] %vm716_vm4, %v694_v8 }
 0x24a   :  { %v682_v9 = vpop.xlane.xlu1 %681  ;;  %v351_v10 = vpop.xlane.xlu0 %350 }
 0x24b   :  { %v692_v11 = vadd.f32 %v682_v9, %v351_v10 }
 0x24d   :  { %717 = vst.msk [vmem:[%s1389_s6] sm:$0xff] %vm716_vm4, %v692_v11 }
 0x24e   :  { %v377_v12 = vpop.xlane.xlu1 %376  ;;  %v360_v13 = vpop.xlane.xlu0 %359 }
 0x252   :  { %v691_v14 = vpop.xlane.xlu0 %690  ;;  %v354_v15 = vpop.xlane.xlu1 %353 }
 0x253   :  { %v695_v16 = vadd.f32 %v691_v14, %v360_v13 }
 0x255   :  { %720 = vst.msk [vmem:[%s1389_s6 + $0x18] sm:$0xff] %vm716_vm4, %v695_v16 }
 0x256   :  { %v685_v17 = vpop.xlane.xlu0 %684  ;;  %v371_v18 = vpop.xlane.xlu1 %370 }
 0x257   :  { %v693_v19 = vadd.f32 %v685_v17, %v354_v15 }
 0x259   :  { %718 = vst.msk [vmem:[%s1389_s6 + $0x8] sm:$0xff] %vm716_vm4, %v693_v19 }
 0x25a   :  { %v380_v20 = vpop.xlane.xlu0 %379  ;;  %v702_v21 = vpop.xlane.xlu1 %701 }
 0x25b   :  { %v712_v22 = vadd.f32 %v702_v21, %v371_v18 }
 0x25d   :  { %721 = vst.msk [vmem:[%s1390_s7] sm:$0xff] %vm716_vm4, %v712_v22 }
 0x25e   :  { %v374_v23 = vpop.xlane.xlu0 %373  ;;  %v708_v24 = vpop.xlane.xlu1 %707 }
 0x25f   :  { %v714_v25 = vadd.f32 %v708_v24, %v377_v12 }
 0x261   :  { %723 = vst.msk [vmem:[%s1390_s7 + $0x10] sm:$0xff] %vm716_vm4, %v714_v25 }
 0x262   :  { %v705_v26 = vpop.xlane.xlu0 %704 }
 0x263   :  { %v713_v4 = vadd.f32 %v705_v26, %v374_v23 }
 0x265   :  { %722 = vst.msk [vmem:[%s1390_s7 + $0x8] sm:$0xff] %vm716_vm4, %v713_v4 }
 0x266   :  { %v711_v3 = vpop.xlane.xlu0 %710 }
 0x267   :  { %v715_v27 = vadd.f32 %v711_v3, %v380_v20 }
 0x269   :  { %724 = vst.msk [vmem:[%s1390_s7 + $0x18] sm:$0xff] %vm716_vm4, %v715_v27 }
 0x26a   :  { %1157 = dma.done.wait [#allocation4], 512  }
 0x26b   :  { %1158 = vsyncadd [#allocation4], 4294966784 }
 0x26c   :  { %748 = vsyncpa [#allocation3], 1 }
 0x26d   :  { %749 = vsyncpa [#allocation6], 1 }
 0x26e   :  { %750 = vsyncpa [#allocation4], 1 }

</bundles_post_ra>
